<compile_context>
chip_gen: v5e
topology: v5e:2x2
jax: 0.10.0
libtpu: 0.0.40
codegen_flags: <defaults>
</compile_context>

<pallas_src>
import jax
import jax.numpy as jnp
from jax.experimental import pallas as pl
from jax.experimental.pallas import tpu as pltpu


# Conservative working-set budget for kernel buffers: well under v7x's 64 MiB physical
# VMEM and the v5e/v6e scoped defaults we override explicitly below.
_VMEM_TILE_BUDGET = 32 * 1024 * 1024
# Above this W size the fully-resident-weight kernel is replaced by the K/N-tiled one.
_RESIDENT_W_MAX_BYTES = 4 * 1024 * 1024
_VMEM_LIMIT_FLOOR = 16 * 1024 * 1024
_VMEM_LIMIT_CAP = 48 * 1024 * 1024


def _ceil_div(a, b):
    return -(-a // b)


def _round_up(v, m):
    return _ceil_div(v, m) * m


def _pick_divisor_tile(dim, target, quantum):
    """Largest multiple of `quantum` that divides `dim` and is <= target.

    Falls back to `dim` itself (fully resident along that axis) when no such divisor
    exists -- keeps the K reduction free of garbage from masked boundary reads.
    """
    if dim <= target or dim % quantum != 0:
        return dim
    t = (min(target, dim) // quantum) * quantum
    while t >= quantum:
        if dim % t == 0:
            return t
        t -= quantum
    return dim


def _pgv_fused_kernel(x_ref, w_ref, b_ref, o_ref):
    # x: (tm, in_dim), w: (in_dim, out_dim) resident, b: (1, out_dim) -> o: (tm, out_dim)
    y = jnp.dot(x_ref[...], w_ref[...], preferred_element_type=jnp.float32)
    y = y + b_ref[...].astype(jnp.float32)
    # ReLU; Dropout is the identity in eval mode.
    o_ref[...] = jnp.maximum(y, 0.0).astype(o_ref.dtype)


def _pgv_tiled_kernel(x_ref, w_ref, b_ref, o_ref, acc_ref):
    # grid = (grid_m, grid_n, grid_k); reduction axis K last, marked "arbitrary".
    k = pl.program_id(2)

    @pl.when(k == 0)
    def _init():
        acc_ref[...] = jnp.zeros_like(acc_ref)

    acc_ref[...] += jnp.dot(x_ref[...], w_ref[...], preferred_element_type=jnp.float32)

    @pl.when(k == pl.num_programs(2) - 1)
    def _finalize():
        y = acc_ref[...] + b_ref[...].astype(jnp.float32)
        o_ref[...] = jnp.maximum(y, 0.0).astype(o_ref.dtype)


def private_global_view(
    x,
    w,
    b,
    *,
    compute_dtype=None,            # e.g. jnp.bfloat16: MXU-native operands, half HBM reads
    out_dtype=None,                # e.g. jnp.bfloat16: halves the output HBM stream
    row_tile=512,                  # target rows per grid step (rounded to a multiple of 8)
    block_n=None,                  # force the K/N-tiled path with this output-column tile
    block_k=None,                  # force the K/N-tiled path with this reduction tile
    allow_xla_small_fallback=True,
):
    """relu(x @ w + b); x: (..., in_dim), w: (in_dim, out_dim), b: (1, out_dim)."""
    orig_shape = x.shape
    in_dim = int(orig_shape[-1])
    out_dim = int(w.shape[1])
    assert w.shape == (in_dim, out_dim), w.shape
    assert b.shape == (1, out_dim), b.shape

    if out_dtype is None:
        out_dtype = x.dtype

    # Collapse all leading dims into one row axis M (the Linear is shared across them).
    M = 1
    for d in orig_shape[:-1]:
        M *= int(d)
    x2 = x.reshape(M, in_dim)

    # Tiny problems: let XLA fuse it; pallas_call launch + pipeline prologue would dominate.
    if allow_xla_small_fallback and (M < 64 or M * in_dim * out_dim < (1 << 21)):
        y = jax.nn.relu(x2 @ w + b)
        return y.astype(out_dtype).reshape(*orig_shape[:-1], out_dim)

    if compute_dtype is not None:
        x2 = x2.astype(compute_dtype)
        w = w.astype(compute_dtype)

    bytes_x = jnp.dtype(x2.dtype).itemsize
    bytes_w = jnp.dtype(w.dtype).itemsize
    bytes_b = jnp.dtype(b.dtype).itemsize
    bytes_o = jnp.dtype(out_dtype).itemsize

    w_bytes_total = in_dim * out_dim * bytes_w
    use_tiled = (block_n is not None) or (block_k is not None) or (
        w_bytes_total > _RESIDENT_W_MAX_BYTES)

    cost = pl.CostEstimate(
        flops=2 * M * in_dim * out_dim,
        transcendentals=0,
        bytes_accessed=(M * in_dim * bytes_x + w_bytes_total
                        + out_dim * bytes_b + M * out_dim * bytes_o),
    )

    if not use_tiled:
        # ---------------- Fused, resident-weight path ----------------
        # VMEM math: W/b double-buffered by the pipeline, x/out tiles double-buffered.
        fixed = 2 * (w_bytes_total + out_dim * bytes_b)
        per_row = 2 * (in_dim * bytes_x + out_dim * bytes_o)
        avail = _VMEM_TILE_BUDGET - fixed
        tm_cap = max(8, (avail // per_row // 8) * 8) if avail > 8 * per_row else 8
        tm = min(int(row_tile), tm_cap, _round_up(M, 8))
        if M >= 256:
            # Prefer >= 2 row blocks so the "parallel" axis feeds both TensorCores (v7x).
            tm = min(tm, _round_up(_ceil_div(M, 2), 8))
        tm = max(8, (tm // 8) * 8)
        grid_m = _ceil_div(M, tm)

        need = fixed + per_row * tm
        vmem_limit = int(min(max(2 * need, _VMEM_LIMIT_FLOOR), _VMEM_LIMIT_CAP))

        out = pl.pallas_call(
            _pgv_fused_kernel,
            out_shape=jax.ShapeDtypeStruct((M, out_dim), out_dtype),
            grid_spec=pl.GridSpec(
                grid=(grid_m,),
                in_specs=[
                    pl.BlockSpec((tm, in_dim), lambda i: (i, 0)),       # x rows, tiled
                    pl.BlockSpec((in_dim, out_dim), lambda i: (0, 0)),  # W, resident
                    pl.BlockSpec((1, out_dim), lambda i: (0, 0)),       # b, resident
                ],
                out_specs=pl.BlockSpec((tm, out_dim), lambda i: (i, 0)),
            ),
            compiler_params=pltpu.CompilerParams(
                dimension_semantics=("parallel",),
                vmem_limit_bytes=vmem_limit,
            ),
            cost_estimate=cost,
        )(x2, w, b)
    else:
        # ---------------- K/N-tiled accumulator path (large in_dim / out_dim) ----------------
        tn = int(block_n) if block_n is not None else _pick_divisor_tile(out_dim, 256, 128)
        tk = int(block_k) if block_k is not None else _pick_divisor_tile(in_dim, 512, 128)
        assert out_dim % tn == 0 and in_dim % tk == 0, "N/K tiles must divide the layer dims"

        per_row = 2 * (tk * bytes_x + tn * bytes_o) + tn * 4        # x/out tiles + f32 acc
        fixed = 2 * (tk * tn * bytes_w + tn * bytes_b)              # W / b tiles
        avail = _VMEM_TILE_BUDGET - fixed
        tm_cap = max(8, (avail // per_row // 8) * 8) if avail > 8 * per_row else 8
        tm = min(int(row_tile), tm_cap, _round_up(M, 8))
        if M >= 256:
            tm = min(tm, _round_up(_ceil_div(M, 2), 8))
        tm = max(8, (tm // 8) * 8)

        grid = (_ceil_div(M, tm), out_dim // tn, in_dim // tk)
        need = fixed + per_row * tm
        vmem_limit = int(min(max(2 * need, _VMEM_LIMIT_FLOOR), _VMEM_LIMIT_CAP))

        out = pl.pallas_call(
            _pgv_tiled_kernel,
            out_shape=jax.ShapeDtypeStruct((M, out_dim), out_dtype),
            grid_spec=pltpu.PrefetchScalarGridSpec(
                num_scalar_prefetch=0,
                grid=grid,
                in_specs=[
                    pl.BlockSpec((tm, tk), lambda i, j, k: (i, k)),
                    pl.BlockSpec((tk, tn), lambda i, j, k: (k, j)),
                    pl.BlockSpec((1, tn), lambda i, j, k: (0, j)),
                ],
                out_specs=pl.BlockSpec((tm, tn), lambda i, j, k: (i, j)),
                scratch_shapes=[pltpu.VMEM((tm, tn), jnp.float32)],
            ),
            compiler_params=pltpu.CompilerParams(
                dimension_semantics=("parallel", "parallel", "arbitrary"),
                vmem_limit_bytes=vmem_limit,
            ),
            cost_estimate=cost,
        )(x2, w, b)

    return out.reshape(*orig_shape[:-1], out_dim)


def private_global_view_ref(x, w, b):
    # Pure-JAX reference (eval-mode forward: dropout is identity).
    return jax.nn.relu(x @ w + b)


if __name__ == "__main__":
    # Small shapes consistent with the module: batch=2, seq=8, in_dim=32, out_dim=64.
    B, N, IN_DIM, OUT_DIM = 2, 8, 32, 64

    key = jax.random.PRNGKey(0)
    kx, kw, kb = jax.random.split(key, 3)
    x = jax.random.normal(kx, (B, N, IN_DIM), dtype=jnp.float32)
    # Linear weight pre-transposed to (in_dim, out_dim); bias as (1, out_dim).
    w = jax.random.normal(kw, (IN_DIM, OUT_DIM), dtype=jnp.float32) * 0.1
    b = jax.random.normal(kb, (1, OUT_DIM), dtype=jnp.float32) * 0.1

    ref = private_global_view_ref(x, w, b)

    # 1) f32 Pallas path (fused, resident-W kernel).
    out = jax.block_until_ready(
        private_global_view(x, w, b, allow_xla_small_fallback=False))
    assert out.shape == (B, N, OUT_DIM), f"bad shape {out.shape}"
    assert jnp.allclose(out, ref, atol=1e-5, rtol=1e-5), "f32 kernel mismatch vs reference"
    assert bool(jnp.all(out >= 0.0)), "ReLU output must be non-negative"

    # 2) bf16-operand path (halves HBM reads, MXU-native datapath; f32 accumulate).
    out_bf16 = jax.block_until_ready(
        private_global_view(x, w, b, compute_dtype=jnp.bfloat16,
                            out_dtype=jnp.float32, allow_xla_small_fallback=False))
    assert jnp.allclose(out_bf16, ref, atol=5e-2, rtol=5e-2), "bf16 kernel mismatch vs reference"

    # 3) K/N-tiled accumulator path (exercised with explicit tile sizes).
    M2, IN2, OUT2 = 128, 256, 256
    k2x, k2w, k2b = jax.random.split(jax.random.PRNGKey(1), 3)
    x_big = jax.random.normal(k2x, (M2, IN2), dtype=jnp.float32)
    w_big = jax.random.normal(k2w, (IN2, OUT2), dtype=jnp.float32) * 0.05
    b_big = jax.random.normal(k2b, (1, OUT2), dtype=jnp.float32) * 0.05
    out_big = jax.block_until_ready(
        private_global_view(x_big, w_big, b_big, allow_xla_small_fallback=False,
                            block_n=128, block_k=128))
    ref_big = private_global_view_ref(x_big, w_big, b_big)
    assert jnp.allclose(out_big, ref_big, atol=1e-4, rtol=1e-4), "tiled kernel mismatch"
    assert bool(jnp.all(out_big >= 0.0))

    # 4) Small-problem XLA fallback (default behavior) — same semantics.
    out_fb = jax.block_until_ready(private_global_view(x, w, b))
    assert jnp.allclose(out_fb, ref, atol=1e-5, rtol=1e-5), "fallback mismatch"

    print("KERNEL_OK")
</pallas_src>

<mosaic_0001>
module attributes {stable_mosaic.version = 11 : i64} {
  func.func @_pgv_fused_kernel(%arg0: i32, %arg1: memref<16x32xf32, #tpu.memory_space<vmem>>, %arg2: memref<32x64xf32, #tpu.memory_space<vmem>>, %arg3: memref<1x64xf32, #tpu.memory_space<vmem>>, %arg4: memref<16x64xf32, #tpu.memory_space<vmem>>) attributes {dimension_semantics = [#tpu.dimension_semantics<parallel>], iteration_bounds = array<i64: 1>, scalar_prefetch = 0 : i64, scratch_operands = 0 : i64, tpu.core_type = #tpu.core_type<tc>, window_params = [{transform_indices = @transform_0, window_bounds = array<i64: 16, 32>}, {pipeline_mode = #tpu.pipeline_mode<synchronous>, transform_indices = @transform_1, window_bounds = array<i64: 32, 64>}, {pipeline_mode = #tpu.pipeline_mode<synchronous>, transform_indices = @transform_2, window_bounds = array<i64: 1, 64>}, {transform_indices = @transform_3, window_bounds = array<i64: 16, 64>}]} {
    %c0 = arith.constant 0 : index
    %c0_0 = arith.constant 0 : index
    %0 = vector.load %arg1[%c0, %c0_0] : memref<16x32xf32, #tpu.memory_space<vmem>>, vector<16x32xf32>
    %c0_1 = arith.constant 0 : index
    %c0_2 = arith.constant 0 : index
    %1 = vector.load %arg2[%c0_1, %c0_2] : memref<32x64xf32, #tpu.memory_space<vmem>>, vector<32x64xf32>
    %cst = arith.constant dense<0.000000e+00> : vector<16x64xf32>
    %2 = tpu.matmul %0, %1, %cst {dimension_numbers = #tpu.dot_dimension_numbers<[1], [0], [0], [1], [0, 0, 1, 1], [], []>} : vector<16x32xf32>, vector<32x64xf32>, vector<16x64xf32> -> vector<16x64xf32>
    %c0_3 = arith.constant 0 : index
    %c0_4 = arith.constant 0 : index
    %3 = vector.load %arg3[%c0_3, %c0_4] : memref<1x64xf32, #tpu.memory_space<vmem>>, vector<1x64xf32>
    %4 = vector.broadcast %3 : vector<1x64xf32> to vector<16x64xf32>
    %5 = arith.addf %2, %4 : vector<16x64xf32>
    %cst_5 = arith.constant 0.000000e+00 : f32
    %6 = vector.broadcast %cst_5 : f32 to vector<16x64xf32>
    %7 = arith.maximumf %5, %6 : vector<16x64xf32>
    %c0_6 = arith.constant 0 : index
    %c0_7 = arith.constant 0 : index
    %8 = vector.load %arg4[%c0_6, %c0_7] : memref<16x64xf32, #tpu.memory_space<vmem>>, vector<16x64xf32>
    tpu.vector_store %arg4[%c0_6, %c0_7], %7 {strides = array<i32>} : memref<16x64xf32, #tpu.memory_space<vmem>>, vector<16x64xf32>,
    return
  }
  func.func @transform_0(%arg0: i32) -> (i32, i32) {
    %c0_i32 = arith.constant 0 : i32
    %c0_i32_0 = arith.constant 0 : i32
    return %arg0, %c0_i32 : i32, i32
  }
  func.func @transform_1(%arg0: i32) -> (i32, i32) {
    %c0_i32 = arith.constant 0 : i32
    %c0_i32_0 = arith.constant 0 : i32
    %c0_i32_1 = arith.constant 0 : i32
    return %c0_i32, %c0_i32_0 : i32, i32
  }
  func.func @transform_2(%arg0: i32) -> (i32, i32) {
    %c0_i32 = arith.constant 0 : i32
    %c0_i32_0 = arith.constant 0 : i32
    %c0_i32_1 = arith.constant 0 : i32
    return %c0_i32, %c0_i32_0 : i32, i32
  }
  func.func @transform_3(%arg0: i32) -> (i32, i32) {
    %c0_i32 = arith.constant 0 : i32
    %c0_i32_0 = arith.constant 0 : i32
    return %arg0, %c0_i32 : i32, i32
  }
}

</mosaic_0001>

<bundles_post_ra>
// kernel: tpu_custom_call.1
= control target key start
LH: loop header
LB: loop body
LE: loop exit
PB: predicated region body
PF: predicated region fallthrough
CT: control target
= control target key end

     0   :  { %8 = vsyncpa [#allocation3], 0  ;;  %s248_s0 = inlined_call_operand.hbm [shape: f32[16,32], index: 0, kind: input, shape index: {}]   ;;  %s249_s1 = inlined_call_operand.hbm [shape: f32[32,64], index: 1, kind: input, shape index: {}]   ;;  %s250_s2 = inlined_call_operand.vmem [shape: f32[1,64], index: 2, kind: input, shape index: {}]   ;;  %s251_s3 = inlined_call_operand.hbm [shape: f32[16,64], index: 3, kind: output, shape index: {}]  }
   0x1   :  { %9 = vsyncpa [#allocation6], 0 }
   0x2   :  { %10 = vsyncpa [#allocation4], 0  ;;  %s15_s14 = sshll.u32 %s248_s0, 4  ;;  %s202_s15 = smov [#allocation2]   ;;  %s16_s14 = int_to_ptr.hbm [resolvable:$true] %s15_s14 }
   0x3   :  { %s17_s16 = sshll.u32 %s202_s15, 4  ;;  %s28_s19 = sshll.u32 %s249_s1, 4  ;;  %s18_s16 = int_to_ptr.vmem [resolvable:$true] %s17_s16  ;;  %s29_s19 = int_to_ptr.hbm [resolvable:$true] %s28_s19 }
   0x4   :  { %s203_s20 = smov 128   ;;  %s204_s21 = smov 8  }
   0x5   :  { %23 = dma.hbm_to_vmem [thread:$0]  %s16_s14, 256, %s18_s16, [#allocation3], %s203_s20, %s203_s20, %s204_s21  }
   0x6   :  { %s205_s22 = smov [#allocation5]  }
   0x7   :  { %s30_s23 = sshll.u32 %s205_s22, 4  ;;  %s31_s23 = int_to_ptr.vmem [resolvable:$true] %s30_s23 }
   0x8   :  { %36 = dma.hbm_to_vmem [thread:$0]  %s29_s19, 512, %s31_s23, [#allocation6], %s203_s20, %s203_s20, %s204_s21  }
   0x9   :  { %196 = dma.done.wait [#allocation3], 256  }
   0xa   :  { %197 = vsyncadd [#allocation3], 4294967040 }
   0xb   :  { %198 = dma.done.wait [#allocation6], 512  }
   0xc   :  { %199 = vsyncadd [#allocation6], 4294966784  ;;  %v52_v0 = vld [vmem:[#allocation5 + $0x18] sm:$0xff]  ;;  %v51_v1 = vld [vmem:[#allocation5 + $0x10] sm:$0xff]  ;;  %vm57_vm0 = vcmask 261120   ;;  %s206_s24 = smov [#allocation7]  }
   0xd   :  { %76 = vmatpush.msra.mxu0 %v52_v0  ;;  %114 = vmatpush.msra.mxu1 %v52_v0  ;;  %v50_v2 = vld [vmem:[#allocation5 + $0x8] sm:$0xff]  ;;  %v49_v3 = vld [vmem:[#allocation5] sm:$0xff]  ;;  %v47_v4 = vld [vmem:[#allocation2] sm:$0xff]  ;;  %s96_s25 = sshll.u32 %s206_s24, 4  ;;  %s98_s28 = sshll.u32 %s251_s3, 4  ;;  %vm89_vm1 = vcmask 523264   ;;  %s97_s25 = int_to_ptr.vmem [resolvable:$true] %s96_s25  ;;  %s99_s28 = int_to_ptr.hbm [resolvable:$true] %s98_s28 }
   0xe   :  { %v48_v5 = vld [vmem:[#allocation2 + $0x8] sm:$0xff]  ;;  %v123_v6 = vld [vmem:[%s250_s2] ss:$0 sm:$0xff] }
   0xf   :  { %77 = vmatpush.msra.mxu0 %v51_v1  ;;  %115 = vmatpush.msra.mxu1 %v51_v1 }
  0x11   :  { %78 = vmatpush.msra.mxu0 %v50_v2  ;;  %116 = vmatpush.msra.mxu1 %v50_v2 }
  0x13   :  { %79 = vmatpush.msra.mxu0 %v49_v3  ;;  %117 = vmatpush.msra.mxu1 %v49_v3 }
  0x14   :  { %112 = vmatmul.msk.f32.vlgmr.msra.gmra.mxu0 %vm57_vm0, %v47_v4  ;;  %113 = vmatmul.msk.f32.vlgmr.msra.gmra.mxu1 %vm57_vm0, %v48_v5 }
  0x91   :  { %v81_v7 = vpop.f32.mrf.mxu0  ;;  %v84_v8 = vpop.f32.mrf.mxu1 }
  0x92   :  { %v82_v9 = vadd.f32 %v123_v6, %v81_v7  ;;  %v85_v10 = vadd.f32 %v123_v6, %v84_v8 }
  0x94   :  { %v87_v11 = vmax.f32 %v82_v9, 0.0  ;;  %v88_v12 = vmax.f32 %v85_v10, 0.0 }
  0x96   :  { %90 = vst.msk [vmem:[#allocation7] sm:$0xff] %vm89_vm1, %v87_v11 }
  0x97   :  { %91 = vst.msk [vmem:[#allocation7 + $0x8] sm:$0xff] %vm89_vm1, %v88_v12 }
  0x98   :  { %104 = dma.vmem_to_hbm [thread:$0]  %s97_s25, 256, %s99_s28, [#allocation4], %s203_s20, %s203_s20, %s204_s21  }
  0x99   :  { %200 = dma.done.wait [#allocation4], 256  }
  0x9a   :  { %201 = vsyncadd [#allocation4], 4294967040 }
  0x9b   :  { %109 = vsyncpa [#allocation3], 1 }
  0x9c   :  { %110 = vsyncpa [#allocation6], 1 }
  0x9d   :  { %111 = vsyncpa [#allocation4], 1 }

</bundles_post_ra>
